<compile_context>
chip_gen: v7x
topology: tpu7x:2x2x1
jax: 0.10.0
libtpu: 0.0.40
codegen_flags: <defaults>
</compile_context>

<pallas_src>
import functools

import jax
import jax.numpy as jnp
from jax.experimental import pallas as pl
from jax.experimental.pallas import tpu as pltpu


def _vmem_capacity_bytes(default=64 * 1024 * 1024):
    """Physical VMEM per TensorCore; conservative 64 MiB fallback (v7x-safe)."""
    try:
        info = pltpu.get_tpu_info()
        v = getattr(info, "vmem_capacity_bytes", None)
        if isinstance(v, int) and v > 0:
            return v
    except Exception:
        pass
    return default


def _detect_num_cores(default=1):
    """TensorCores per chip to shard the batch across (v7x has 2)."""
    try:
        info = pltpu.get_tpu_info()
        for attr in ("num_tensorcores", "tensorcores_per_chip", "num_cores",
                     "core_count"):
            v = getattr(info, attr, None)
            if isinstance(v, int) and v > 0:
                return v
    except Exception:
        pass
    return default


def _focal_loss_kernel(x_ref, tgt_ref, wt_ref, wce_out_ref, wsum_out_ref,
                       acc_wce_ref, acc_w_ref, *, n_rows, tiles_per_core):
    """Per-tile log-softmax + NLL + masked element-wise accumulation.

    Grid = (num_cores [parallel], tiles_per_core [arbitrary]).
    Each core accumulates into its own (tile_n, 1) scratch and writes its
    partial [sum(w*ce), sum(w)] at its last tile; the final divide + focal
    transform happens in the wrapper.
    """
    p = pl.program_id(0)
    i = pl.program_id(1)
    last = pl.num_programs(1) - 1

    @pl.when(i == 0)
    def _init():
        acc_wce_ref[...] = jnp.zeros_like(acc_wce_ref)
        acc_w_ref[...] = jnp.zeros_like(acc_w_ref)

    x = x_ref[...].astype(jnp.float32)          # (tile_n, C), f32 cast in-kernel
    tgt = tgt_ref[...]                          # (tile_n, 1) int32 class indices
    w_t = wt_ref[...]                           # (tile_n, 1) f32 per-sample weight
    tn, c = x.shape

    # Numerically-stable log-sum-exp over the class axis.
    m = jnp.max(x, axis=-1, keepdims=True)                                  # (tn, 1)
    lse = m + jnp.log(jnp.sum(jnp.exp(x - m), axis=-1, keepdims=True))      # (tn, 1)

    # One-hot extraction of the target logit (no gather needed).
    cls = jax.lax.broadcasted_iota(jnp.int32, (tn, c), 1)
    onehot = cls == tgt
    tgt_logit = jnp.sum(jnp.where(onehot, x, 0.0), axis=-1, keepdims=True)  # (tn, 1)
    ce_i = lse - tgt_logit                                                  # per-sample CE

    # Mask rows past n_rows (padded final tile / clamped duplicate tiles).
    # NOTE: keep this a lane SELECT — NaN/Inf from garbage padding logits is
    # discarded by where(); a multiplicative 0/1 mask would propagate NaNs.
    global_tile = p * tiles_per_core + i
    row = global_tile * tn + jax.lax.broadcasted_iota(jnp.int32, (tn, 1), 0)
    valid = row < n_rows

    # Element-wise accumulation (no cross-sublane reduce per step).
    acc_wce_ref[...] += jnp.where(valid, w_t * ce_i, 0.0)
    acc_w_ref[...] += jnp.where(valid, w_t, 0.0)

    @pl.when(i == last)
    def _finalize():
        wce_out_ref[...] = jnp.sum(acc_wce_ref[...], axis=0,
                                   keepdims=True).reshape(1, 1, 1)
        wsum_out_ref[...] = jnp.sum(acc_w_ref[...], axis=0,
                                    keepdims=True).reshape(1, 1, 1)


def focal_loss_tpu(logits, target, weight=None, gamma=0.0, tile_n=None,
                   num_cores=None):
    """FocalLoss.forward equivalent. `logits` (N, C) any float dtype, `target` (N,)."""
    n, c = logits.shape
    if weight is None:
        weight = jnp.ones((c,), jnp.float32)
    weight = weight.astype(jnp.float32)
    tgt = target.astype(jnp.int32)

    # Wrapper-side gather of per-sample class weights (tiny O(N) XLA op; frees
    # one full (N, C) VPU pass + an XLU reduction per tile inside the kernel).
    w_t = weight[tgt].reshape(n, 1)
    tgt2 = tgt.reshape(n, 1)

    # ---- per-generation VMEM budget (v5e/v6e: 128 MiB -> ~16 MiB/buffer;
    # v7x: 64 MiB -> ~8 MiB/buffer).  Sized in f32 terms so in-kernel f32
    # temporaries fit alongside the double-buffered native-dtype input.
    itemsize = jnp.dtype(logits.dtype).itemsize
    c_pad = ((c + 127) // 128) * 128
    vmem_cap = _vmem_capacity_bytes()
    budget_bytes = vmem_cap // 8
    vmem_limit = int(vmem_cap * 3 // 4)

    # Sub-32-bit dtypes pack rows per sublane: round tile_n accordingly.
    row_align = 8 * max(1, 4 // itemsize)       # f32->8, bf16->16, 1B->32
    if tile_n is None:
        tile_n = budget_bytes // (c_pad * 4)    # no artificial cap
    tile_n = max(row_align, (int(tile_n) // row_align) * row_align)
    if tile_n >= n:
        tile_n = n                              # full-extent block is always legal

    tiles_total = pl.cdiv(n, tile_n)
    if num_cores is None:
        num_cores = _detect_num_cores()
    ncores = max(1, min(int(num_cores), tiles_total))
    tiles_per_core = pl.cdiv(tiles_total, ncores)
    max_blk = tiles_total - 1                   # clamp so no tile DMAs OOB

    def x_map(p, i):
        return (jnp.minimum(p * tiles_per_core + i, max_blk), 0)

    def side_map(p, i):
        return (jnp.minimum(p * tiles_per_core + i, max_blk), 0)

    cost = pl.CostEstimate(
        flops=6 * n * c,
        transcendentals=n * c,
        bytes_accessed=n * c * itemsize + n * 8 + 8 * ncores,
    )

    kernel = functools.partial(_focal_loss_kernel, n_rows=n,
                               tiles_per_core=tiles_per_core)

    wce_parts, w_parts = pl.pallas_call(
        kernel,
        out_shape=(
            jax.ShapeDtypeStruct((ncores, 1, 1), jnp.float32),   # per-core sum(w*ce)
            jax.ShapeDtypeStruct((ncores, 1, 1), jnp.float32),   # per-core sum(w)
        ),
        grid_spec=pltpu.PrefetchScalarGridSpec(
            num_scalar_prefetch=0,
            grid=(ncores, tiles_per_core),
            in_specs=[
                pl.BlockSpec((tile_n, c), x_map),      # logits tile (native dtype)
                pl.BlockSpec((tile_n, 1), side_map),   # targets
                pl.BlockSpec((tile_n, 1), side_map),   # per-sample weights
            ],
            out_specs=(
                pl.BlockSpec((1, 1, 1), lambda p, i: (p, 0, 0)),
                pl.BlockSpec((1, 1, 1), lambda p, i: (p, 0, 0)),
            ),
            scratch_shapes=[
                pltpu.VMEM((tile_n, 1), jnp.float32),  # elementwise acc: w_t*ce_i
                pltpu.VMEM((tile_n, 1), jnp.float32),  # elementwise acc: w_t
            ],
        ),
        compiler_params=pltpu.CompilerParams(
            dimension_semantics=("parallel", "arbitrary"),
            vmem_limit_bytes=vmem_limit,
        ),
        cost_estimate=cost,
    )(logits, tgt2, w_t)

    # Finalize (trivial scalar XLA ops): weighted-mean CE, then focal transform.
    # NOTE: if sum(w_t) == 0 this is 0/0 -> NaN, matching the PyTorch reference.
    ce = jnp.sum(wce_parts) / jnp.sum(w_parts)
    p = jnp.exp(-ce)
    return ((1.0 - p) ** gamma) * ce


def _reference(logits, target, weight, gamma):
    """Pure-JAX reference mirroring torch semantics (for self-check)."""
    logp = jax.nn.log_softmax(logits.astype(jnp.float32), axis=-1)
    ce_i = -jnp.take_along_axis(logp, target[:, None], axis=-1)[:, 0]
    w_t = weight[target]
    ce = jnp.sum(w_t * ce_i) / jnp.sum(w_t)
    p = jnp.exp(-ce)
    return (1.0 - p) ** gamma * ce


if __name__ == "__main__":
    key = jax.random.PRNGKey(0)
    k1, k2, k3 = jax.random.split(key, 3)

    N, C = 20, 16
    gamma = 2.0
    logits = jax.random.normal(k1, (N, C), dtype=jnp.float32)
    target = jax.random.randint(k2, (N,), 0, C, dtype=jnp.int32)
    weight = 0.5 + jax.random.uniform(k3, (C,), dtype=jnp.float32)

    ref = _reference(logits, target, weight, gamma)

    # 1) Default (single-tile, auto core count) path.
    loss = jax.block_until_ready(
        focal_loss_tpu(logits, target, weight=weight, gamma=gamma))
    assert jnp.allclose(loss, ref, rtol=1e-5, atol=1e-6), (loss, ref)

    # 2) Multi-tile path with a masked, padded final tile (N=20, tile_n=8 -> 3 tiles).
    loss_tiled = jax.block_until_ready(
        focal_loss_tpu(logits, target, weight=weight, gamma=gamma, tile_n=8))
    assert jnp.allclose(loss_tiled, ref, rtol=1e-5, atol=1e-6), (loss_tiled, ref)

    # 3) Forced 2-core split (exercises the parallel axis + clamped/padded tiles;
    #    on 1-TC chips the two grid slices simply run sequentially).
    loss_2c = jax.block_until_ready(
        focal_loss_tpu(logits, target, weight=weight, gamma=gamma, tile_n=8,
                       num_cores=2))
    assert jnp.allclose(loss_2c, ref, rtol=1e-5, atol=1e-6), (loss_2c, ref)

    # 4) Native bf16 logits (no wrapper-side up-cast; cast happens in-kernel).
    logits_bf16 = logits.astype(jnp.bfloat16)
    ref_bf16 = _reference(logits_bf16.astype(jnp.float32), target, weight, gamma)
    loss_bf16 = jax.block_until_ready(
        focal_loss_tpu(logits_bf16, target, weight=weight, gamma=gamma))
    assert jnp.allclose(loss_bf16, ref_bf16, rtol=1e-4, atol=1e-5), (loss_bf16, ref_bf16)

    print("KERNEL_OK")
</pallas_src>

<mosaic_0001>
module attributes {stable_mosaic.version = 11 : i64} {
  func.func @_focal_loss_kernel(%arg0: i32, %arg1: i32, %arg2: memref<20x16xf32, #tpu.memory_space<vmem>>, %arg3: memref<20x1xi32, #tpu.memory_space<vmem>>, %arg4: memref<20x1xf32, #tpu.memory_space<vmem>>, %arg5: memref<1x1x1xf32, #tpu.memory_space<vmem>>, %arg6: memref<1x1x1xf32, #tpu.memory_space<vmem>>, %arg7: memref<20x1xf32, #tpu.memory_space<vmem>>, %arg8: memref<20x1xf32, #tpu.memory_space<vmem>>) attributes {dimension_semantics = [#tpu.dimension_semantics<parallel>, #tpu.dimension_semantics<arbitrary>], iteration_bounds = array<i64: 1, 1>, scalar_prefetch = 0 : i64, scratch_operands = 2 : i64, tpu.core_type = #tpu.core_type<tc>, window_params = [{transform_indices = @transform_0, window_bounds = array<i64: 20, 16>}, {transform_indices = @transform_1, window_bounds = array<i64: 20, 1>}, {transform_indices = @transform_2, window_bounds = array<i64: 20, 1>}, {transform_indices = @transform_3, window_bounds = array<i64: 1, 1, 1>}, {transform_indices = @transform_4, window_bounds = array<i64: 1, 1, 1>}]} {
    %c0_i32 = arith.constant 0 : i32
    %0 = arith.cmpi eq, %arg1, %c0_i32 : i32
    %1 = arith.extui %0 : i1 to i32
    %c0_i32_0 = arith.constant 0 : i32
    %2 = arith.cmpi ne, %1, %c0_i32_0 : i32
    scf.if %2 {
      %cst_22 = arith.constant 0.000000e+00 : f32
      %45 = vector.broadcast %cst_22 : f32 to vector<20x1xf32>
      %c0_23 = arith.constant 0 : index
      %c0_24 = arith.constant 0 : index
      %46 = vector.load %arg7[%c0_23, %c0_24] : memref<20x1xf32, #tpu.memory_space<vmem>>, vector<20x1xf32>
      tpu.vector_store %arg7[%c0_23, %c0_24], %45 {strides = array<i32>} : memref<20x1xf32, #tpu.memory_space<vmem>>, vector<20x1xf32>,
      %cst_25 = arith.constant 0.000000e+00 : f32
      %47 = vector.broadcast %cst_25 : f32 to vector<20x1xf32>
      %c0_26 = arith.constant 0 : index
      %c0_27 = arith.constant 0 : index
      %48 = vector.load %arg8[%c0_26, %c0_27] : memref<20x1xf32, #tpu.memory_space<vmem>>, vector<20x1xf32>
      tpu.vector_store %arg8[%c0_26, %c0_27], %47 {strides = array<i32>} : memref<20x1xf32, #tpu.memory_space<vmem>>, vector<20x1xf32>,
    } else {
    }
    %c0 = arith.constant 0 : index
    %c0_1 = arith.constant 0 : index
    %3 = vector.load %arg2[%c0, %c0_1] : memref<20x16xf32, #tpu.memory_space<vmem>>, vector<20x16xf32>
    %c0_2 = arith.constant 0 : index
    %c0_3 = arith.constant 0 : index
    %4 = vector.load %arg3[%c0_2, %c0_3] : memref<20x1xi32, #tpu.memory_space<vmem>>, vector<20x1xi32>
    %c0_4 = arith.constant 0 : index
    %c0_5 = arith.constant 0 : index
    %5 = vector.load %arg4[%c0_4, %c0_5] : memref<20x1xf32, #tpu.memory_space<vmem>>, vector<20x1xf32>
    %cst = arith.constant dense<0xFF800000> : vector<20xf32>
    %6 = vector.multi_reduction <maximumf>, %3, %cst [1] : vector<20x16xf32> to vector<20xf32>
    %7 = vector.shape_cast %6 : vector<20xf32> to vector<20x1xf32>
    %8 = vector.broadcast %7 : vector<20x1xf32> to vector<20x16xf32>
    %9 = arith.subf %3, %8 : vector<20x16xf32>
    %10 = math.exp %9 : vector<20x16xf32>
    %cst_6 = arith.constant dense<0.000000e+00> : vector<20xf32>
    %11 = vector.multi_reduction <add>, %10, %cst_6 [1] : vector<20x16xf32> to vector<20xf32>
    %12 = vector.shape_cast %11 : vector<20xf32> to vector<20x1xf32>
    %13 = math.log %12 : vector<20x1xf32>
    %14 = arith.addf %7, %13 : vector<20x1xf32>
    %15 = tpu.iota {dimensions = array<i32: 1>} : vector<20x16xi32>
    %16 = vector.broadcast %4 : vector<20x1xi32> to vector<20x16xi32>
    %17 = arith.cmpi eq, %15, %16 : vector<20x16xi32>
    %cst_7 = arith.constant 0.000000e+00 : f32
    %18 = vector.broadcast %cst_7 : f32 to vector<20x16xf32>
    %19 = arith.select %17, %3, %18 : vector<20x16xi1>, vector<20x16xf32>
    %cst_8 = arith.constant dense<0.000000e+00> : vector<20xf32>
    %20 = vector.multi_reduction <add>, %19, %cst_8 [1] : vector<20x16xf32> to vector<20xf32>
    %21 = vector.shape_cast %20 : vector<20xf32> to vector<20x1xf32>
    %22 = arith.subf %14, %21 : vector<20x1xf32>
    %c1_i32 = arith.constant 1 : i32
    %23 = arith.muli %arg0, %c1_i32 : i32
    %24 = arith.addi %23, %arg1 : i32
    %c20_i32 = arith.constant 20 : i32
    %25 = arith.muli %24, %c20_i32 : i32
    %26 = tpu.iota {dimensions = array<i32: 0>} : vector<20x1xi32>
    %27 = vector.broadcast %25 : i32 to vector<20x1xi32>
    %28 = arith.addi %27, %26 : vector<20x1xi32>
    %c20_i32_9 = arith.constant 20 : i32
    %29 = vector.broadcast %c20_i32_9 : i32 to vector<20x1xi32>
    %30 = arith.cmpi slt, %28, %29 : vector<20x1xi32>
    %c0_10 = arith.constant 0 : index
    %c0_11 = arith.constant 0 : index
    %31 = vector.load %arg7[%c0_10, %c0_11] : memref<20x1xf32, #tpu.memory_space<vmem>>, vector<20x1xf32>
    %32 = arith.mulf %5, %22 : vector<20x1xf32>
    %cst_12 = arith.constant 0.000000e+00 : f32
    %33 = vector.broadcast %cst_12 : f32 to vector<20x1xf32>
    %34 = arith.select %30, %32, %33 : vector<20x1xi1>, vector<20x1xf32>
    %35 = arith.addf %31, %34 : vector<20x1xf32>
    %c0_13 = arith.constant 0 : index
    %c0_14 = arith.constant 0 : index
    %36 = vector.load %arg7[%c0_13, %c0_14] : memref<20x1xf32, #tpu.memory_space<vmem>>, vector<20x1xf32>
    tpu.vector_store %arg7[%c0_13, %c0_14], %35 {strides = array<i32>} : memref<20x1xf32, #tpu.memory_space<vmem>>, vector<20x1xf32>,
    %c0_15 = arith.constant 0 : index
    %c0_16 = arith.constant 0 : index
    %37 = vector.load %arg8[%c0_15, %c0_16] : memref<20x1xf32, #tpu.memory_space<vmem>>, vector<20x1xf32>
    %cst_17 = arith.constant 0.000000e+00 : f32
    %38 = vector.broadcast %cst_17 : f32 to vector<20x1xf32>
    %39 = arith.select %30, %5, %38 : vector<20x1xi1>, vector<20x1xf32>
    %40 = arith.addf %37, %39 : vector<20x1xf32>
    %c0_18 = arith.constant 0 : index
    %c0_19 = arith.constant 0 : index
    %41 = vector.load %arg8[%c0_18, %c0_19] : memref<20x1xf32, #tpu.memory_space<vmem>>, vector<20x1xf32>
    tpu.vector_store %arg8[%c0_18, %c0_19], %40 {strides = array<i32>} : memref<20x1xf32, #tpu.memory_space<vmem>>, vector<20x1xf32>,
    %c0_i32_20 = arith.constant 0 : i32
    %42 = arith.cmpi eq, %arg1, %c0_i32_20 : i32
    %43 = arith.extui %42 : i1 to i32
    %c0_i32_21 = arith.constant 0 : i32
    %44 = arith.cmpi ne, %43, %c0_i32_21 : i32
    scf.if %44 {
      %c0_22 = arith.constant 0 : index
      %c0_23 = arith.constant 0 : index
      %45 = vector.load %arg7[%c0_22, %c0_23] : memref<20x1xf32, #tpu.memory_space<vmem>>, vector<20x1xf32>
      %cst_24 = arith.constant dense<0.000000e+00> : vector<1xf32>
      %46 = vector.multi_reduction <add>, %45, %cst_24 [0] : vector<20x1xf32> to vector<1xf32>
      %47 = vector.shape_cast %46 : vector<1xf32> to vector<1x1xf32>
      %48 = vector.shape_cast %47 : vector<1x1xf32> to vector<1x1x1xf32>
      %c0_25 = arith.constant 0 : index
      %c0_26 = arith.constant 0 : index
      %c0_27 = arith.constant 0 : index
      %49 = vector.load %arg5[%c0_25, %c0_26, %c0_27] : memref<1x1x1xf32, #tpu.memory_space<vmem>>, vector<1x1x1xf32>
      tpu.vector_store %arg5[%c0_25, %c0_26, %c0_27], %48 {strides = array<i32>} : memref<1x1x1xf32, #tpu.memory_space<vmem>>, vector<1x1x1xf32>,
      %c0_28 = arith.constant 0 : index
      %c0_29 = arith.constant 0 : index
      %50 = vector.load %arg8[%c0_28, %c0_29] : memref<20x1xf32, #tpu.memory_space<vmem>>, vector<20x1xf32>
      %cst_30 = arith.constant dense<0.000000e+00> : vector<1xf32>
      %51 = vector.multi_reduction <add>, %50, %cst_30 [0] : vector<20x1xf32> to vector<1xf32>
      %52 = vector.shape_cast %51 : vector<1xf32> to vector<1x1xf32>
      %53 = vector.shape_cast %52 : vector<1x1xf32> to vector<1x1x1xf32>
      %c0_31 = arith.constant 0 : index
      %c0_32 = arith.constant 0 : index
      %c0_33 = arith.constant 0 : index
      %54 = vector.load %arg6[%c0_31, %c0_32, %c0_33] : memref<1x1x1xf32, #tpu.memory_space<vmem>>, vector<1x1x1xf32>
      tpu.vector_store %arg6[%c0_31, %c0_32, %c0_33], %53 {strides = array<i32>} : memref<1x1x1xf32, #tpu.memory_space<vmem>>, vector<1x1x1xf32>,
    } else {
    }
    return
  }
  func.func @transform_0(%arg0: i32, %arg1: i32) -> (i32, i32) {
    %c1_i32 = arith.constant 1 : i32
    %0 = arith.muli %arg0, %c1_i32 : i32
    %1 = arith.addi %0, %arg1 : i32
    %c0_i32 = arith.constant 0 : i32
    %2 = arith.minsi %1, %c0_i32 : i32
    %c0_i32_0 = arith.constant 0 : i32
    %c0_i32_1 = arith.constant 0 : i32
    return %2, %c0_i32_0 : i32, i32
  }
  func.func @transform_1(%arg0: i32, %arg1: i32) -> (i32, i32) {
    %c1_i32 = arith.constant 1 : i32
    %0 = arith.muli %arg0, %c1_i32 : i32
    %1 = arith.addi %0, %arg1 : i32
    %c0_i32 = arith.constant 0 : i32
    %2 = arith.minsi %1, %c0_i32 : i32
    %c0_i32_0 = arith.constant 0 : i32
    %c0_i32_1 = arith.constant 0 : i32
    return %2, %c0_i32_0 : i32, i32
  }
  func.func @transform_2(%arg0: i32, %arg1: i32) -> (i32, i32) {
    %c1_i32 = arith.constant 1 : i32
    %0 = arith.muli %arg0, %c1_i32 : i32
    %1 = arith.addi %0, %arg1 : i32
    %c0_i32 = arith.constant 0 : i32
    %2 = arith.minsi %1, %c0_i32 : i32
    %c0_i32_0 = arith.constant 0 : i32
    %c0_i32_1 = arith.constant 0 : i32
    return %2, %c0_i32_0 : i32, i32
  }
  func.func @transform_3(%arg0: i32, %arg1: i32) -> (i32, i32, i32) {
    %c0_i32 = arith.constant 0 : i32
    %c0_i32_0 = arith.constant 0 : i32
    %c0_i32_1 = arith.constant 0 : i32
    return %arg0, %c0_i32, %c0_i32_0 : i32, i32, i32
  }
  func.func @transform_4(%arg0: i32, %arg1: i32) -> (i32, i32, i32) {
    %c0_i32 = arith.constant 0 : i32
    %c0_i32_0 = arith.constant 0 : i32
    %c0_i32_1 = arith.constant 0 : i32
    return %arg0, %c0_i32, %c0_i32_0 : i32, i32, i32
  }
}

</mosaic_0001>

<bundles_post_ra>
// kernel: tpu_custom_call.1
= control target key start
LH: loop header
LB: loop body
LE: loop exit
PB: predicated region body
PF: predicated region fallthrough
CT: control target
= control target key end

     0   :  { %10 = vsyncpa [#allocation5], 0  ;;  %vm135_vm0 = vcmask 130048   ;;  %vm142_vm1 = vcmask 125952   ;;  %s530_s0 = inlined_call_operand.vmem [shape: f32[20,16], index: 0, kind: input, shape index: {}]   ;;  %s531_s1 = inlined_call_operand.vmem [shape: s32[20,1], index: 1, kind: input, shape index: {}]   ;;  %s532_s2 = inlined_call_operand.vmem [shape: f32[20,1], index: 2, kind: input, shape index: {}]   ;;  %s533_s3 = inlined_call_operand.hbm [shape: f32[1,1,1], index: 3, kind: output, shape index: {0}]   ;;  %s534_s4 = inlined_call_operand.hbm [shape: f32[1,1,1], index: 4, kind: output, shape index: {1}]  }
   0x1   :  { %v126_v0 = vld [vmem:[%s530_s0] sm:$0xff]  ;;  %v128_v1 = vld [vmem:[%s530_s0 + $0x10] sm:$0xf]  ;;  %v127_v2 = vld [vmem:[%s530_s0 + $0x8] sm:$0xff] }
   0x2   :  { %v136_v3 = vsel %vm135_vm0, %v126_v0, -inf  ;;  %v143_v4 = vsel %vm142_vm1, %v128_v1, -inf }
   0x3   :  { %137 = vmax.xlane.f32.xlu0 %v136_v3  ;;  %144 = vmax.xlane.f32.xlu1 %v143_v4 }
   0x4   :  { %11 = vsyncpa [#allocation7], 0  ;;  %v139_v5 = vsel %vm135_vm0, %v127_v2, -inf  ;;  %v390_v6 = vmov 0   ;;  %v129_v7 = vld [vmem:[%s531_s1] sm:$0xff]  ;;  %v130_v9 = vld [vmem:[%s531_s1 + $0x8] sm:$0xff]  ;;  %v173_v19 = vlaneseq }
   0x5   :  { %328 = vset.pattern.permute.xlu1 %v390_v6  ;;  %329 = vset.pattern.permute.xlu0 %v390_v6  ;;  %v131_v8 = vld [vmem:[%s531_s1 + $0x10] sm:$0xf]  ;;  %vm118_vm5 = vcmask 7168   ;;  %v391_v36 = vmov 0.0   ;;  %vm121_vm6 = vcmask 3072   ;;  %v464_v38 = vld [vmem:[%s532_s2] sm:$0xff] }
   0x6   :  { %v174_v20 = vand.u32 127, %v173_v19  ;;  %119 = vst.msk [vmem:[#allocation2] sm:$0xff] %vm118_vm5, %v391_v36  ;;  %123 = vst.msk [vmem:[#allocation3] sm:$0xff] %vm118_vm5, %v391_v36  ;;  %v205_v37 = vshrl.u32 %v173_v19, 7  ;;  %v472_v42 = vld [vmem:[%s532_s2 + $0x8] sm:$0xff]  ;;  %vm261_vm8 = vcmask 0  }
   0x7   :  { %140 = vmax.xlane.f32.xlu0 %v139_v5  ;;  %120 = vst.msk [vmem:[#allocation2 + $0x8] sm:$0xff] %vm118_vm5, %v391_v36  ;;  %124 = vst.msk [vmem:[#allocation3 + $0x8] sm:$0xff] %vm118_vm5, %v391_v36  ;;  %v480_v45 = vld [vmem:[%s532_s2 + $0x10] sm:$0xf]  ;;  %s392_s2 = smov [#allocation6]  }
   0x8   :  { %122 = vst.msk [vmem:[#allocation2 + $0x10] sm:$0xf] %vm121_vm6, %v391_v36  ;;  %125 = vst.msk [vmem:[#allocation3 + $0x10] sm:$0xf] %vm121_vm6, %v391_v36  ;;  %v466_v40 = vadd.s32 16, %v205_v37  ;;  %s294_s5 = sshll.u32 %s392_s2, 4  ;;  %s295_s5 = int_to_ptr.vmem [resolvable:$true] %s294_s5 }
   0x9   :  { %s342_s6 = scalar_lea.vmem %s295_s5, 16  ;;  %s346_s7 = scalar_lea.vmem %s295_s5, 32 }
   0xa   :  { %vm214_vm7 = vcmp.lt.s32.totalorder %v466_v40, 20  ;;  %p343_p0 = scmp.ne.s32.totalorder %s295_s5, %s342_s6  ;;  %p347_p1 = scmp.lt.s32.totalorder %s295_s5, %s295_s5 }
   0xb   :  { %v237_v46 = vsel %vm214_vm7, %v480_v45, 0.0  ;;  %p348_p2 = scmp.lt.s32.totalorder %s346_s7, %s342_s6 }
   0xd   :  { %v232_v39 = vld [vmem:[#allocation3] sm:$0xff]  ;;  %p349_p3 = por %p348_p2, %p347_p1 }
   0xe   :  { %v238_v41 = vadd.f32 %v232_v39, %v464_v38  ;;  %v233_v43 = vld [vmem:[#allocation3 + $0x8] sm:$0xff] }
   0xf   :  { %v239_v44 = vadd.f32 %v233_v43, %v472_v42  ;;  %v234_v47 = vld [vmem:[#allocation3 + $0x10] sm:$0xf]  ;;  %p350_p4 = pnand %p349_p3, %p343_p0 }
  0x10   :  { %241 = vst.msk [vmem:[#allocation3] sm:$0xff] %vm118_vm5, %v238_v41  ;;  %v240_v48 = vadd.f32 %v237_v46, %v234_v47 }
  0x11   :  { %242 = vst.msk [vmem:[#allocation3 + $0x8] sm:$0xff] %vm118_vm5, %v239_v44 }
  0x12   :  { %243 = vst.msk [vmem:[#allocation3 + $0x10] sm:$0xf] %vm121_vm6, %v240_v48 }
  0x14   :  { %176 = vperm.xlu1 %328, %v129_v7  }
  0x17   :  { %v263_v49 = vld [vmem:[#allocation3] sm:$0xff] }
  0x18   :  { %182 = vperm.xlu1 %328, %v131_v8   ;;  %v264_v50 = vld [vmem:[#allocation3 + $0x8] sm:$0xff]  ;;  %v266_v51 = vsel %vm118_vm5, %v263_v49, 0.0 }
  0x19   :  { %v267_v52 = vsel %vm118_vm5, %v264_v50, 0.0  ;;  %v265_v53 = vld [vmem:[#allocation3 + $0x10] sm:$0xf] }
  0x1a   :  { %v268_v54 = vadd.f32 %v267_v52, %v266_v51  ;;  %v269_v55 = vsel %vm121_vm6, %v265_v53, 0.0 }
  0x1c   :  { %v270_v56 = vadd.f32 %v269_v55, %v268_v54 }
  0x1d   :  { %179 = vperm.xlu0 %329, %v130_v9  }
  0x1e   :  { %v271_v57 = vrot.slane %v270_v56, 4 }
  0x20   :  { %v272_v58 = vadd.f32 %v271_v57, %v270_v56 }
  0x22   :  { %v273_v59 = vrot.slane %v272_v58, 2 }
  0x24   :  { %v274_v60 = vadd.f32 %v273_v59, %v272_v58 }
  0x26   :  { %v275_v61 = vrot.slane %v274_v60, 1 }
  0x28   :  { %v276_v62 = vadd.f32 %v275_v61, %v274_v60 }
  0x2a   :  { %277 = vst.msk [vmem:[#allocation6] sm:$0x1] %vm261_vm8, %v276_v62 }
  0x90   :  { %v440_v10 = vpop.xlane.xlu0 %137  ;;  %v442_v11 = vpop.xlane.xlu1 %144 }
  0x91   :  { %v146_v12 = vsub.f32 %v126_v0, %v440_v10  ;;  %v148_v13 = vsub.f32 %v128_v1, %v442_v11 }
  0x93   :  { %v149_v14 = vmul.f32 1.442695, %v146_v12  ;;  %v153_v15 = vmul.f32 1.442695, %v148_v13 }
  0x94   :  { %v446_v16 = vpop.xlane.xlu0 %140  ;;  %v177_v21 = vpop.permute.xlu1 %176 }
  0x95   :  { %330 = vpow2.f32 %v149_v14  ;;  %v147_v17 = vsub.f32 %v127_v2, %v446_v16  ;;  %vm184_vm2 = vcmp.eq.s32.totalorder %v174_v20, %v177_v21 }
  0x96   :  { %332 = vpow2.f32 %v153_v15  ;;  %v187_v28 = vsel %vm184_vm2, %v126_v0, 0.0 }
  0x97   :  { %v151_v18 = vmul.f32 1.442695, %v147_v17  ;;  %v190_v30 = vsel %vm135_vm0, %v187_v28, 0.0 }
  0x98   :  { %v183_v31 = vpop.permute.xlu1 %182 }
  0x99   :  { %334 = vpow2.f32 %v151_v18  ;;  %vm186_vm4 = vcmp.eq.s32.totalorder %v174_v20, %v183_v31 }
  0x9a   :  { %v189_v34 = vsel %vm186_vm4, %v128_v1, 0.0 }
  0x9b   :  { %v196_v35 = vsel %vm142_vm1, %v189_v34, 0.0 }
  0x9c   :  { %v180_v25 = vpop.permute.xlu0 %179 }
  0x9d   :  { %vm185_vm3 = vcmp.eq.s32.totalorder %v174_v20, %v180_v25 }
  0x9e   :  { %v188_v32 = vsel %vm185_vm3, %v127_v2, 0.0 }
  0x9f   :  { %v331_v22 = vpop.eup %330  ;;  %v193_v33 = vsel %vm135_vm0, %v188_v32, 0.0 }
  0xa0   :  { %v333_v23 = vpop.eup %332  ;;  %v155_v24 = vsel %vm135_vm0, %v331_v22, 0.0 }
  0xa1   :  { %156 = vadd.xlane.f32.xlu1 %v155_v24  ;;  %v161_v26 = vsel %vm142_vm1, %v333_v23, 0.0 }
  0xa3   :  { %v335_v27 = vpop.eup %334 }
  0xa4   :  { %v158_v29 = vsel %vm135_vm0, %v335_v27, 0.0 }
  0xa5   :  { %162 = vadd.xlane.f32.xlu1 %v161_v26  ;;  %159 = vadd.xlane.f32.xlu0 %v158_v29 }
  0xa9   :  { %191 = vadd.xlane.f32.xlu1 %v190_v30 }
  0xad   :  { %194 = vadd.xlane.f32.xlu1 %v193_v33 }
  0xb1   :  { %197 = vadd.xlane.f32.xlu1 %v196_v35 }
  0xb2   :  { %353 = shalt.err (!%p350_p4)
}
  0xb3   :  { %s354_s10 = scalar_lea.hbm %s534_s4, 16 }
  0xb4   :  { %p355_p5 = scmp.ne.s32.totalorder %s534_s4, %s354_s10  ;;  %p358_p6 = scmp.lt.u32.totalorder %s354_s10, %s534_s4 }
  0xb6   :  { %p360_p7 = pnand %p358_p6, %p355_p5 }
  0xb8   :  { %363 = shalt.err (!%p360_p7)
}
  0xb9   :  { %297 = dma.vmem_to_hbm [thread:$0]  %s295_s5, 16, %s534_s4, [#allocation7]   ;;  %v215_v14 = vld [vmem:[#allocation2] sm:$0xff]  ;;  %v216_v23 = vld [vmem:[#allocation2 + $0x8] sm:$0xff] }
  0xba   :  { %s393_s4 = smov [#allocation4]  }
  0xbb   :  { %s284_s17 = sshll.u32 %s393_s4, 4  ;;  %s285_s17 = int_to_ptr.vmem [resolvable:$true] %s284_s17 }
  0xbc   :  { %s364_s18 = scalar_lea.vmem %s285_s17, 16  ;;  %s368_s19 = scalar_lea.vmem %s285_s17, 32 }
  0xbd   :  { %p365_p8 = scmp.ne.s32.totalorder %s285_s17, %s364_s18  ;;  %p369_p9 = scmp.lt.s32.totalorder %s285_s17, %s285_s17 }
  0xbe   :  { %p370_p10 = scmp.lt.s32.totalorder %s368_s19, %s364_s18 }
  0xc0   :  { %p371_p11 = por %p370_p10, %p369_p9 }
  0xc2   :  { %p372_p12 = pnand %p371_p11, %p365_p8 }
 0x12e   :  { %v157_v63 = vpop.xlane.xlu1 %156 }
 0x12f   :  { %336 = vlog2.f32 %v157_v63 }
 0x132   :  { %v163_v0 = vpop.xlane.xlu1 %162  ;;  %v160_v1 = vpop.xlane.xlu0 %159 }
 0x133   :  { %338 = vlog2.f32 %v163_v0 }
 0x134   :  { %340 = vlog2.f32 %v160_v1 }
 0x136   :  { %v192_v2 = vpop.xlane.xlu1 %191 }
 0x139   :  { %v337_v3 = vpop.eup %336 }
 0x13a   :  { %v165_v4 = vmul.f32 0.6931472, %v337_v3  ;;  %v195_v5 = vpop.xlane.xlu1 %194 }
 0x13c   :  { %v170_v6 = vadd.f32 %v165_v4, %v440_v10  ;;  %v217_v10 = vld [vmem:[#allocation2 + $0x10] sm:$0xf] }
 0x13d   :  { %v339_v7 = vpop.eup %338 }
 0x13e   :  { %v341_v8 = vpop.eup %340  ;;  %v169_v9 = vmul.f32 0.6931472, %v339_v7  ;;  %v199_v12 = vsub.f32 %v170_v6, %v192_v2  ;;  %v198_v19 = vpop.xlane.xlu1 %197 }
 0x13f   :  { %v167_v13 = vmul.f32 0.6931472, %v341_v8 }
 0x140   :  { %v218_v15 = vmul.f32 %v199_v12, %v464_v38  ;;  %v172_v17 = vadd.f32 %v169_v9, %v442_v11 }
 0x141   :  { %v171_v18 = vadd.f32 %v167_v13, %v446_v16 }
 0x142   :  { %v224_v20 = vadd.f32 %v218_v15, %v215_v14  ;;  %v201_v21 = vsub.f32 %v172_v17, %v198_v19 }
 0x143   :  { %v200_v22 = vsub.f32 %v171_v18, %v195_v5 }
 0x144   :  { %228 = vst.msk [vmem:[#allocation2] sm:$0xff] %vm118_vm5, %v224_v20  ;;  %v220_v24 = vmul.f32 %v201_v21, %v480_v45 }
 0x145   :  { %v219_v25 = vmul.f32 %v200_v22, %v472_v42 }
 0x146   :  { %v223_v26 = vsel %vm214_vm7, %v220_v24, 0.0 }
 0x147   :  { %v225_v27 = vadd.f32 %v219_v25, %v216_v23  ;;  %v226_v28 = vadd.f32 %v223_v26, %v217_v10 }
 0x149   :  { %229 = vst.msk [vmem:[#allocation2 + $0x8] sm:$0xff] %vm118_vm5, %v225_v27 }
 0x14a   :  { %231 = vst.msk [vmem:[#allocation2 + $0x10] sm:$0xf] %vm121_vm6, %v226_v28 }
 0x14b   :  { %v247_v11 = vld [vmem:[#allocation2] sm:$0xff] }
 0x14c   :  { %v250_v30 = vsel %vm118_vm5, %v247_v11, 0.0 }
 0x150   :  { %v248_v16 = vld [vmem:[#allocation2 + $0x8] sm:$0xff] }
 0x151   :  { %v249_v29 = vld [vmem:[#allocation2 + $0x10] sm:$0xf]  ;;  %v251_v31 = vsel %vm118_vm5, %v248_v16, 0.0 }
 0x152   :  { %v253_v32 = vsel %vm121_vm6, %v249_v29, 0.0  ;;  %v252_v33 = vadd.f32 %v251_v31, %v250_v30 }
 0x154   :  { %v254_v34 = vadd.f32 %v253_v32, %v252_v33 }
 0x156   :  { %v255_v35 = vrot.slane %v254_v34, 4 }
 0x158   :  { %v256_v36 = vadd.f32 %v255_v35, %v254_v34 }
 0x15a   :  { %v257_v37 = vrot.slane %v256_v36, 2 }
 0x15c   :  { %v258_v38 = vadd.f32 %v257_v37, %v256_v36 }
 0x15e   :  { %v259_v39 = vrot.slane %v258_v38, 1 }
 0x160   :  { %v260_v40 = vadd.f32 %v259_v39, %v258_v38 }
 0x162   :  { %262 = vst.msk [vmem:[#allocation4] sm:$0x1] %vm261_vm8, %v260_v40 }
 0x163   :  { %375 = shalt.err (!%p372_p12)
}
 0x164   :  { %s376_s22 = scalar_lea.hbm %s533_s3, 16 }
 0x165   :  { %p377_p13 = scmp.ne.s32.totalorder %s533_s3, %s376_s22  ;;  %p380_p0 = scmp.lt.u32.totalorder %s376_s22, %s533_s3 }
 0x167   :  { %p382_p1 = pnand %p380_p0, %p377_p13 }
 0x169   :  { %385 = shalt.err (!%p382_p1)
}
 0x16a   :  { %287 = dma.vmem_to_hbm [thread:$0]  %s285_s17, 16, %s533_s3, [#allocation5]  }
 0x16b   :  { %386 = dma.done.wait [#allocation5], 16  }
 0x16c   :  { %387 = vsyncadd [#allocation5], 4294967280 }
 0x16d   :  { %388 = dma.done.wait [#allocation7], 16  }
 0x16e   :  { %389 = vsyncadd [#allocation7], 4294967280 }
 0x16f   :  { %304 = vsyncpa [#allocation5], 1 }
 0x170   :  { %305 = vsyncpa [#allocation7], 1 }

</bundles_post_ra>
